<compile_context>
chip_gen: v6e
topology: v6e:2x2x1
jax: 0.10.0
libtpu: 0.0.40
codegen_flags: <defaults>
</compile_context>

<pallas_src>
import functools

import jax
import jax.numpy as jnp
import numpy as np
from jax.experimental import pallas as pl
from jax.experimental.pallas import tpu as pltpu


def _round_up(x, m):
    return ((x + m - 1) // m) * m


def _pick_tb(batch):
    # Larger batch tiles amortize the ~0.35us per-grid-step overhead and put
    # more gathers in flight; keep >=2 grid steps when batch allows so both
    # v7x TensorCores get work under dimension_semantics=("parallel",).
    if batch >= 256:
        return 64
    if batch >= 64:
        return 32
    if batch >= 32:
        return 16
    return 8


# ---------------------------------------------------------------------------
# Path A: fused table staged once in VMEM (small / medium vocab).
# ---------------------------------------------------------------------------
def _nbow_vmem_kernel(ids_ref, fused_ref, bias_ref, out_ref, *, seq_len, tb):
    # ids_ref  : SMEM (B_pad*S,) int32    scalar-prefetched, flattened token ids
    # fused_ref: VMEM (V_pad, O_pad) f32  fused (embedding @ W) table, resident
    # bias_ref : VMEM (1, O_pad) f32
    # out_ref  : VMEM (TB, O_pad) f32
    bt = pl.program_id(0)
    o_pad = out_ref.shape[-1]
    inv_s = jnp.float32(1.0 / seq_len)
    bias = bias_ref[...]
    # Statically unrolled over (tb, seq_len); for long sequences this should
    # become lax.fori_loop(..., unroll=8) to bound code size — the demo S is
    # tiny so full unroll gives the LLO scheduler maximum visibility.
    for bi in range(tb):
        base = (bt * tb + bi) * seq_len
        row = jnp.zeros((1, o_pad), jnp.float32)
        for s in range(seq_len):
            tok = ids_ref[base + s]                       # scalar SMEM read
            row = row + fused_ref[pl.ds(tok, 1), :]       # dynamic row load
        out_ref[pl.ds(bi, 1), :] = row * inv_s + bias


# ---------------------------------------------------------------------------
# Path B: HBM-resident table, multi-buffered manual row-gather DMAs.
# ---------------------------------------------------------------------------
def _nbow_hbm_kernel(ids_ref, fused_hbm, bias_ref, out_ref, rowbuf, sem,
                     *, seq_len, nbuf):
    # ids_ref  : SMEM (B_pad*S,) int32     scalar-prefetched token ids
    # fused_hbm: HBM  (V_pad, O_pad) f32   fused table, never staged whole
    # bias_ref : VMEM (1, O_pad) f32
    # out_ref  : VMEM (TB, O_pad) f32
    # rowbuf   : VMEM (NBUF*TB, O_pad) f32 gather landing slots
    # sem      : DMA  (NBUF,)              one semaphore per slot (bytes-counted)
    bt = pl.program_id(0)
    tb, o_pad = out_ref.shape
    S = seq_len

    def fetch(s, slot):
        # Issue TB independent row-gather DMAs for sequence step `s`; all of
        # them signal this slot's semaphore.
        for bi in range(tb):
            tok = ids_ref[(bt * tb + bi) * S + s]         # scalar SMEM read
            pltpu.make_async_copy(
                fused_hbm.at[pl.ds(tok, 1), :],
                rowbuf.at[pl.ds(slot * tb + bi, 1), :],
                sem.at[slot],
            ).start()

    def wait_slot(slot):
        # One wait per slot: the descriptor covers the whole slot slab, so its
        # byte count (tb * o_pad * 4) equals the total signalled by the tb
        # row copies (same pattern as the paged-attention multi-page copy).
        slab = rowbuf.at[pl.ds(slot * tb, tb), :]
        pltpu.make_async_copy(slab, slab, sem.at[slot]).wait()

    # Prime the pipeline: keep nbuf-1 sequence steps of gathers in flight.
    for s in range(min(nbuf - 1, S)):
        fetch(s, s % nbuf)

    acc = jnp.zeros((tb, o_pad), jnp.float32)             # lives in vregs
    for s in range(S):
        slot = s % nbuf
        nxt = s + nbuf - 1
        if nxt < S:
            # Prefetch (and read its ids from SMEM) BEFORE waiting on the
            # current slot: true look-ahead pipeline, and the id reads are not
            # stalled by .wait() breaking SMEM sst->sld forwarding.
            fetch(nxt, nxt % nbuf)
        wait_slot(slot)
        acc = acc + rowbuf[pl.ds(slot * tb, tb), :]

    # mean over the full sequence length (matches emb.mean(dim=1)), add bias,
    # single unmasked lane-dense store.
    out_ref[...] = acc * jnp.float32(1.0 / S) + bias_ref[...]


# ---------------------------------------------------------------------------
# Wrapper
# ---------------------------------------------------------------------------
def prepare_nbow_params(emb_table, w, b, *, vmem_table_budget_bytes=24 << 20):
    """One-time, weights-only preprocessing (hoisted out of the per-call path).

    Folds the Linear weight into the embedding table, pads the output dim
    lane-dense to a multiple of 128 and the vocab to a multiple of 8, and
    decides whether the fused table should be staged in VMEM.
    padding_idx semantics: nn.Embedding only zeroes that row, so as long as
    the caller's emb_table has that row zeroed, the fused row is zero too.
    """
    V, E = emb_table.shape
    O = w.shape[1]
    o_pad = _round_up(max(O, 1), 128)
    # TODO(synk): add a non-fused path (gather E-wide rows + in-kernel matmul)
    # for the O_pad > ceil(E/128)*128 regime; never hit for NBoW classifiers.
    fused = jnp.dot(emb_table.astype(jnp.float32), w.astype(jnp.float32),
                    preferred_element_type=jnp.float32)              # [V, O]
    v_pad = max(_round_up(V, 8), 64)
    fused_p = jnp.pad(fused, ((0, v_pad - V), (0, o_pad - O)))
    bias_p = jnp.pad(b.astype(jnp.float32).reshape(1, O),
                     ((0, 0), (0, o_pad - O)))
    table_bytes = v_pad * o_pad * 4
    # Conservative: assume the resident-table input may be double-buffered;
    # keeps the choice safe under v7x's 64 MiB VMEM / 32 MiB scoped default.
    stage_in_vmem = 2 * table_bytes <= vmem_table_budget_bytes
    return dict(fused=fused_p, bias=bias_p, vocab_size=V, out_dim=O,
                o_pad=o_pad, v_pad=v_pad, table_bytes=table_bytes,
                stage_in_vmem=stage_in_vmem)


def nbow_forward(ids, params, *, tb=None, nbuf=4, force_hbm_gather=False):
    """ids: [B, S] int.  Returns logits [B, O] f32, numerically equal (up to
    f32 reassociation) to  emb_table[ids].mean(axis=1) @ W + b."""
    B, S = ids.shape
    V, O = params["vocab_size"], params["out_dim"]
    o_pad, v_pad = params["o_pad"], params["v_pad"]
    fused_p, bias_p = params["fused"], params["bias"]

    if tb is None:
        tb = _pick_tb(B)
    b_pad_rows = _round_up(max(B, tb), tb)
    grid = (b_pad_rows // tb,)

    # Clamp ids (PyTorch would raise on out-of-range; we clamp), pad batch rows
    # with token 0 (discarded by the wrapper slice), and flatten to 1-D so the
    # SMEM scalar-prefetch buffer pads to next-pow2 bytes, not an (8,128) tile.
    ids_p = jnp.pad(jnp.clip(ids.astype(jnp.int32), 0, V - 1),
                    ((0, b_pad_rows - B), (0, 0))).reshape(-1)

    use_vmem = params["stage_in_vmem"] and not force_hbm_gather
    vmem_limit = None

    if use_vmem:
        kernel = functools.partial(_nbow_vmem_kernel, seq_len=S, tb=tb)
        in_specs = [
            pl.BlockSpec((v_pad, o_pad), lambda bt, ids: (0, 0)),  # table, resident
            pl.BlockSpec((1, o_pad), lambda bt, ids: (0, 0)),      # bias
        ]
        scratch_shapes = []
        need = 2 * params["table_bytes"] + (4 << 20)
        if need > (16 << 20):          # only override when the default may not fit
            vmem_limit = int(need)
    else:
        kernel = functools.partial(_nbow_hbm_kernel, seq_len=S, nbuf=nbuf)
        in_specs = [
            pl.BlockSpec(memory_space=pl.ANY),                     # table stays in HBM
            pl.BlockSpec((1, o_pad), lambda bt, ids: (0, 0)),      # bias
        ]
        scratch_shapes = [
            pltpu.VMEM((nbuf * tb, o_pad), jnp.float32),           # gather slots
            pltpu.SemaphoreType.DMA((nbuf,)),                      # one sem per slot
        ]

    out = pl.pallas_call(
        kernel,
        out_shape=jax.ShapeDtypeStruct((b_pad_rows, o_pad), jnp.float32),
        grid_spec=pltpu.PrefetchScalarGridSpec(
            num_scalar_prefetch=1,                                 # ids -> SMEM
            grid=grid,
            in_specs=in_specs,
            out_specs=pl.BlockSpec((tb, o_pad), lambda bt, ids: (bt, 0)),
            scratch_shapes=scratch_shapes,
        ),
        compiler_params=pltpu.CompilerParams(
            dimension_semantics=("parallel",),
            vmem_limit_bytes=vmem_limit),
    )(ids_p, fused_p, bias_p)

    return out[:B, :O]


if __name__ == "__main__":
    # Small, self-consistent demo shapes.
    vocab_size = 64
    embedding_dim = 32
    output_dim = 4
    pad_index = 1
    batch, seq = 2, 8

    key = jax.random.PRNGKey(0)
    k_emb, k_w, k_b, k_ids = jax.random.split(key, 4)

    # nn.Embedding: N(0,1) init with padding_idx row zeroed.
    emb_table = jax.random.normal(k_emb, (vocab_size, embedding_dim), jnp.float32)
    emb_table = emb_table.at[pad_index].set(0.0)

    # nn.Linear: U(-1/sqrt(E), 1/sqrt(E)); weight stored transposed as [E, O].
    bound = 1.0 / float(np.sqrt(embedding_dim))
    w = jax.random.uniform(k_w, (embedding_dim, output_dim), jnp.float32,
                           minval=-bound, maxval=bound)
    b = jax.random.uniform(k_b, (output_dim,), jnp.float32,
                           minval=-bound, maxval=bound)

    ids = jax.random.randint(k_ids, (batch, seq), 0, vocab_size, dtype=jnp.int32)
    # sprinkle a pad token (forward still divides by full seq length, matching
    # PyTorch's emb.mean(dim=1))
    ids = ids.at[0, seq - 1].set(pad_index)

    # Weights-only preprocessing, paid once.
    params = prepare_nbow_params(emb_table, w, b)

    # Pure-JAX reference.
    ref = emb_table[ids].mean(axis=1) @ w + b

    # Path A: fused table resident in VMEM (auto-selected for this vocab size).
    out_vmem = jax.block_until_ready(nbow_forward(ids, params))
    np.testing.assert_allclose(np.asarray(out_vmem), np.asarray(ref),
                               rtol=1e-5, atol=1e-5)

    # Path B: HBM-resident table with the multi-buffered row-gather pipeline
    # (the path used when the fused table does not fit VMEM).
    out_hbm = jax.block_until_ready(
        nbow_forward(ids, params, force_hbm_gather=True))
    np.testing.assert_allclose(np.asarray(out_hbm), np.asarray(ref),
                               rtol=1e-5, atol=1e-5)

    print("KERNEL_OK")
</pallas_src>

<mosaic_0001>
module attributes {stable_mosaic.version = 11 : i64} {
  func.func @_nbow_vmem_kernel(%arg0: i32, %arg1: memref<64xi32, #tpu.memory_space<smem>>, %arg2: memref<64x128xf32, #tpu.memory_space<vmem>>, %arg3: memref<1x128xf32, #tpu.memory_space<vmem>>, %arg4: memref<8x128xf32, #tpu.memory_space<vmem>>) attributes {dimension_semantics = [#tpu.dimension_semantics<parallel>], iteration_bounds = array<i64: 1>, scalar_prefetch = 1 : i64, scratch_operands = 0 : i64, tpu.core_type = #tpu.core_type<tc>, window_params = [{pipeline_mode = #tpu.pipeline_mode<synchronous>, transform_indices = @transform_0, window_bounds = array<i64: 64, 128>}, {pipeline_mode = #tpu.pipeline_mode<synchronous>, transform_indices = @transform_1, window_bounds = array<i64: 1, 128>}, {transform_indices = @transform_2, window_bounds = array<i64: 8, 128>}]} {
    %c0 = arith.constant 0 : index
    %c0_0 = arith.constant 0 : index
    %0 = vector.load %arg3[%c0, %c0_0] : memref<1x128xf32, #tpu.memory_space<vmem>>, vector<1x128xf32>
    %c8_i32 = arith.constant 8 : i32
    %1 = arith.muli %arg0, %c8_i32 : i32
    %c0_i32 = arith.constant 0 : i32
    %2 = arith.addi %1, %c0_i32 : i32
    %c8_i32_1 = arith.constant 8 : i32
    %3 = arith.muli %2, %c8_i32_1 : i32
    %cst = arith.constant 0.000000e+00 : f32
    %4 = vector.broadcast %cst : f32 to vector<1x128xf32>
    %c0_i32_2 = arith.constant 0 : i32
    %5 = arith.addi %3, %c0_i32_2 : i32
    %6 = arith.index_cast %5 : i32 to index
    %7 = memref.load %arg1[%6] : memref<64xi32, #tpu.memory_space<smem>>
    %8 = arith.index_cast %7 : i32 to index
    %c0_3 = arith.constant 0 : index
    %9 = vector.load %arg2[%8, %c0_3] : memref<64x128xf32, #tpu.memory_space<vmem>>, vector<1x128xf32>
    %10 = arith.addf %4, %9 : vector<1x128xf32>
    %c1_i32 = arith.constant 1 : i32
    %11 = arith.addi %3, %c1_i32 : i32
    %12 = arith.index_cast %11 : i32 to index
    %13 = memref.load %arg1[%12] : memref<64xi32, #tpu.memory_space<smem>>
    %14 = arith.index_cast %13 : i32 to index
    %c0_4 = arith.constant 0 : index
    %15 = vector.load %arg2[%14, %c0_4] : memref<64x128xf32, #tpu.memory_space<vmem>>, vector<1x128xf32>
    %16 = arith.addf %10, %15 : vector<1x128xf32>
    %c2_i32 = arith.constant 2 : i32
    %17 = arith.addi %3, %c2_i32 : i32
    %18 = arith.index_cast %17 : i32 to index
    %19 = memref.load %arg1[%18] : memref<64xi32, #tpu.memory_space<smem>>
    %20 = arith.index_cast %19 : i32 to index
    %c0_5 = arith.constant 0 : index
    %21 = vector.load %arg2[%20, %c0_5] : memref<64x128xf32, #tpu.memory_space<vmem>>, vector<1x128xf32>
    %22 = arith.addf %16, %21 : vector<1x128xf32>
    %c3_i32 = arith.constant 3 : i32
    %23 = arith.addi %3, %c3_i32 : i32
    %24 = arith.index_cast %23 : i32 to index
    %25 = memref.load %arg1[%24] : memref<64xi32, #tpu.memory_space<smem>>
    %26 = arith.index_cast %25 : i32 to index
    %c0_6 = arith.constant 0 : index
    %27 = vector.load %arg2[%26, %c0_6] : memref<64x128xf32, #tpu.memory_space<vmem>>, vector<1x128xf32>
    %28 = arith.addf %22, %27 : vector<1x128xf32>
    %c4_i32 = arith.constant 4 : i32
    %29 = arith.addi %3, %c4_i32 : i32
    %30 = arith.index_cast %29 : i32 to index
    %31 = memref.load %arg1[%30] : memref<64xi32, #tpu.memory_space<smem>>
    %32 = arith.index_cast %31 : i32 to index
    %c0_7 = arith.constant 0 : index
    %33 = vector.load %arg2[%32, %c0_7] : memref<64x128xf32, #tpu.memory_space<vmem>>, vector<1x128xf32>
    %34 = arith.addf %28, %33 : vector<1x128xf32>
    %c5_i32 = arith.constant 5 : i32
    %35 = arith.addi %3, %c5_i32 : i32
    %36 = arith.index_cast %35 : i32 to index
    %37 = memref.load %arg1[%36] : memref<64xi32, #tpu.memory_space<smem>>
    %38 = arith.index_cast %37 : i32 to index
    %c0_8 = arith.constant 0 : index
    %39 = vector.load %arg2[%38, %c0_8] : memref<64x128xf32, #tpu.memory_space<vmem>>, vector<1x128xf32>
    %40 = arith.addf %34, %39 : vector<1x128xf32>
    %c6_i32 = arith.constant 6 : i32
    %41 = arith.addi %3, %c6_i32 : i32
    %42 = arith.index_cast %41 : i32 to index
    %43 = memref.load %arg1[%42] : memref<64xi32, #tpu.memory_space<smem>>
    %44 = arith.index_cast %43 : i32 to index
    %c0_9 = arith.constant 0 : index
    %45 = vector.load %arg2[%44, %c0_9] : memref<64x128xf32, #tpu.memory_space<vmem>>, vector<1x128xf32>
    %46 = arith.addf %40, %45 : vector<1x128xf32>
    %c7_i32 = arith.constant 7 : i32
    %47 = arith.addi %3, %c7_i32 : i32
    %48 = arith.index_cast %47 : i32 to index
    %49 = memref.load %arg1[%48] : memref<64xi32, #tpu.memory_space<smem>>
    %50 = arith.index_cast %49 : i32 to index
    %c0_10 = arith.constant 0 : index
    %51 = vector.load %arg2[%50, %c0_10] : memref<64x128xf32, #tpu.memory_space<vmem>>, vector<1x128xf32>
    %52 = arith.addf %46, %51 : vector<1x128xf32>
    %cst_11 = arith.constant 1.250000e-01 : f32
    %53 = vector.broadcast %cst_11 : f32 to vector<1x128xf32>
    %54 = arith.mulf %52, %53 : vector<1x128xf32>
    %55 = arith.addf %54, %0 : vector<1x128xf32>
    %c0_12 = arith.constant 0 : index
    %c0_13 = arith.constant 0 : index
    %56 = vector.load %arg4[%c0_12, %c0_13] : memref<8x128xf32, #tpu.memory_space<vmem>>, vector<1x128xf32>
    tpu.vector_store %arg4[%c0_12, %c0_13], %55 {strides = array<i32>} : memref<8x128xf32, #tpu.memory_space<vmem>>, vector<1x128xf32>,
    %c8_i32_14 = arith.constant 8 : i32
    %57 = arith.muli %arg0, %c8_i32_14 : i32
    %c1_i32_15 = arith.constant 1 : i32
    %58 = arith.addi %57, %c1_i32_15 : i32
    %c8_i32_16 = arith.constant 8 : i32
    %59 = arith.muli %58, %c8_i32_16 : i32
    %cst_17 = arith.constant 0.000000e+00 : f32
    %60 = vector.broadcast %cst_17 : f32 to vector<1x128xf32>
    %c0_i32_18 = arith.constant 0 : i32
    %61 = arith.addi %59, %c0_i32_18 : i32
    %62 = arith.index_cast %61 : i32 to index
    %63 = memref.load %arg1[%62] : memref<64xi32, #tpu.memory_space<smem>>
    %64 = arith.index_cast %63 : i32 to index
    %c0_19 = arith.constant 0 : index
    %65 = vector.load %arg2[%64, %c0_19] : memref<64x128xf32, #tpu.memory_space<vmem>>, vector<1x128xf32>
    %66 = arith.addf %60, %65 : vector<1x128xf32>
    %c1_i32_20 = arith.constant 1 : i32
    %67 = arith.addi %59, %c1_i32_20 : i32
    %68 = arith.index_cast %67 : i32 to index
    %69 = memref.load %arg1[%68] : memref<64xi32, #tpu.memory_space<smem>>
    %70 = arith.index_cast %69 : i32 to index
    %c0_21 = arith.constant 0 : index
    %71 = vector.load %arg2[%70, %c0_21] : memref<64x128xf32, #tpu.memory_space<vmem>>, vector<1x128xf32>
    %72 = arith.addf %66, %71 : vector<1x128xf32>
    %c2_i32_22 = arith.constant 2 : i32
    %73 = arith.addi %59, %c2_i32_22 : i32
    %74 = arith.index_cast %73 : i32 to index
    %75 = memref.load %arg1[%74] : memref<64xi32, #tpu.memory_space<smem>>
    %76 = arith.index_cast %75 : i32 to index
    %c0_23 = arith.constant 0 : index
    %77 = vector.load %arg2[%76, %c0_23] : memref<64x128xf32, #tpu.memory_space<vmem>>, vector<1x128xf32>
    %78 = arith.addf %72, %77 : vector<1x128xf32>
    %c3_i32_24 = arith.constant 3 : i32
    %79 = arith.addi %59, %c3_i32_24 : i32
    %80 = arith.index_cast %79 : i32 to index
    %81 = memref.load %arg1[%80] : memref<64xi32, #tpu.memory_space<smem>>
    %82 = arith.index_cast %81 : i32 to index
    %c0_25 = arith.constant 0 : index
    %83 = vector.load %arg2[%82, %c0_25] : memref<64x128xf32, #tpu.memory_space<vmem>>, vector<1x128xf32>
    %84 = arith.addf %78, %83 : vector<1x128xf32>
    %c4_i32_26 = arith.constant 4 : i32
    %85 = arith.addi %59, %c4_i32_26 : i32
    %86 = arith.index_cast %85 : i32 to index
    %87 = memref.load %arg1[%86] : memref<64xi32, #tpu.memory_space<smem>>
    %88 = arith.index_cast %87 : i32 to index
    %c0_27 = arith.constant 0 : index
    %89 = vector.load %arg2[%88, %c0_27] : memref<64x128xf32, #tpu.memory_space<vmem>>, vector<1x128xf32>
    %90 = arith.addf %84, %89 : vector<1x128xf32>
    %c5_i32_28 = arith.constant 5 : i32
    %91 = arith.addi %59, %c5_i32_28 : i32
    %92 = arith.index_cast %91 : i32 to index
    %93 = memref.load %arg1[%92] : memref<64xi32, #tpu.memory_space<smem>>
    %94 = arith.index_cast %93 : i32 to index
    %c0_29 = arith.constant 0 : index
    %95 = vector.load %arg2[%94, %c0_29] : memref<64x128xf32, #tpu.memory_space<vmem>>, vector<1x128xf32>
    %96 = arith.addf %90, %95 : vector<1x128xf32>
    %c6_i32_30 = arith.constant 6 : i32
    %97 = arith.addi %59, %c6_i32_30 : i32
    %98 = arith.index_cast %97 : i32 to index
    %99 = memref.load %arg1[%98] : memref<64xi32, #tpu.memory_space<smem>>
    %100 = arith.index_cast %99 : i32 to index
    %c0_31 = arith.constant 0 : index
    %101 = vector.load %arg2[%100, %c0_31] : memref<64x128xf32, #tpu.memory_space<vmem>>, vector<1x128xf32>
    %102 = arith.addf %96, %101 : vector<1x128xf32>
    %c7_i32_32 = arith.constant 7 : i32
    %103 = arith.addi %59, %c7_i32_32 : i32
    %104 = arith.index_cast %103 : i32 to index
    %105 = memref.load %arg1[%104] : memref<64xi32, #tpu.memory_space<smem>>
    %106 = arith.index_cast %105 : i32 to index
    %c0_33 = arith.constant 0 : index
    %107 = vector.load %arg2[%106, %c0_33] : memref<64x128xf32, #tpu.memory_space<vmem>>, vector<1x128xf32>
    %108 = arith.addf %102, %107 : vector<1x128xf32>
    %cst_34 = arith.constant 1.250000e-01 : f32
    %109 = vector.broadcast %cst_34 : f32 to vector<1x128xf32>
    %110 = arith.mulf %108, %109 : vector<1x128xf32>
    %111 = arith.addf %110, %0 : vector<1x128xf32>
    %c1 = arith.constant 1 : index
    %c0_35 = arith.constant 0 : index
    %112 = vector.load %arg4[%c1, %c0_35] : memref<8x128xf32, #tpu.memory_space<vmem>>, vector<1x128xf32>
    tpu.vector_store %arg4[%c1, %c0_35], %111 {strides = array<i32>} : memref<8x128xf32, #tpu.memory_space<vmem>>, vector<1x128xf32>,
    %c8_i32_36 = arith.constant 8 : i32
    %113 = arith.muli %arg0, %c8_i32_36 : i32
    %c2_i32_37 = arith.constant 2 : i32
    %114 = arith.addi %113, %c2_i32_37 : i32
    %c8_i32_38 = arith.constant 8 : i32
    %115 = arith.muli %114, %c8_i32_38 : i32
    %cst_39 = arith.constant 0.000000e+00 : f32
    %116 = vector.broadcast %cst_39 : f32 to vector<1x128xf32>
    %c0_i32_40 = arith.constant 0 : i32
    %117 = arith.addi %115, %c0_i32_40 : i32
    %118 = arith.index_cast %117 : i32 to index
    %119 = memref.load %arg1[%118] : memref<64xi32, #tpu.memory_space<smem>>
    %120 = arith.index_cast %119 : i32 to index
    %c0_41 = arith.constant 0 : index
    %121 = vector.load %arg2[%120, %c0_41] : memref<64x128xf32, #tpu.memory_space<vmem>>, vector<1x128xf32>
    %122 = arith.addf %116, %121 : vector<1x128xf32>
    %c1_i32_42 = arith.constant 1 : i32
    %123 = arith.addi %115, %c1_i32_42 : i32
    %124 = arith.index_cast %123 : i32 to index
    %125 = memref.load %arg1[%124] : memref<64xi32, #tpu.memory_space<smem>>
    %126 = arith.index_cast %125 : i32 to index
    %c0_43 = arith.constant 0 : index
    %127 = vector.load %arg2[%126, %c0_43] : memref<64x128xf32, #tpu.memory_space<vmem>>, vector<1x128xf32>
    %128 = arith.addf %122, %127 : vector<1x128xf32>
    %c2_i32_44 = arith.constant 2 : i32
    %129 = arith.addi %115, %c2_i32_44 : i32
    %130 = arith.index_cast %129 : i32 to index
    %131 = memref.load %arg1[%130] : memref<64xi32, #tpu.memory_space<smem>>
    %132 = arith.index_cast %131 : i32 to index
    %c0_45 = arith.constant 0 : index
    %133 = vector.load %arg2[%132, %c0_45] : memref<64x128xf32, #tpu.memory_space<vmem>>, vector<1x128xf32>
    %134 = arith.addf %128, %133 : vector<1x128xf32>
    %c3_i32_46 = arith.constant 3 : i32
    %135 = arith.addi %115, %c3_i32_46 : i32
    %136 = arith.index_cast %135 : i32 to index
    %137 = memref.load %arg1[%136] : memref<64xi32, #tpu.memory_space<smem>>
    %138 = arith.index_cast %137 : i32 to index
    %c0_47 = arith.constant 0 : index
    %139 = vector.load %arg2[%138, %c0_47] : memref<64x128xf32, #tpu.memory_space<vmem>>, vector<1x128xf32>
    %140 = arith.addf %134, %139 : vector<1x128xf32>
    %c4_i32_48 = arith.constant 4 : i32
    %141 = arith.addi %115, %c4_i32_48 : i32
    %142 = arith.index_cast %141 : i32 to index
    %143 = memref.load %arg1[%142] : memref<64xi32, #tpu.memory_space<smem>>
    %144 = arith.index_cast %143 : i32 to index
    %c0_49 = arith.constant 0 : index
    %145 = vector.load %arg2[%144, %c0_49] : memref<64x128xf32, #tpu.memory_space<vmem>>, vector<1x128xf32>
    %146 = arith.addf %140, %145 : vector<1x128xf32>
    %c5_i32_50 = arith.constant 5 : i32
    %147 = arith.addi %115, %c5_i32_50 : i32
    %148 = arith.index_cast %147 : i32 to index
    %149 = memref.load %arg1[%148] : memref<64xi32, #tpu.memory_space<smem>>
    %150 = arith.index_cast %149 : i32 to index
    %c0_51 = arith.constant 0 : index
    %151 = vector.load %arg2[%150, %c0_51] : memref<64x128xf32, #tpu.memory_space<vmem>>, vector<1x128xf32>
    %152 = arith.addf %146, %151 : vector<1x128xf32>
    %c6_i32_52 = arith.constant 6 : i32
    %153 = arith.addi %115, %c6_i32_52 : i32
    %154 = arith.index_cast %153 : i32 to index
    %155 = memref.load %arg1[%154] : memref<64xi32, #tpu.memory_space<smem>>
    %156 = arith.index_cast %155 : i32 to index
    %c0_53 = arith.constant 0 : index
    %157 = vector.load %arg2[%156, %c0_53] : memref<64x128xf32, #tpu.memory_space<vmem>>, vector<1x128xf32>
    %158 = arith.addf %152, %157 : vector<1x128xf32>
    %c7_i32_54 = arith.constant 7 : i32
    %159 = arith.addi %115, %c7_i32_54 : i32
    %160 = arith.index_cast %159 : i32 to index
    %161 = memref.load %arg1[%160] : memref<64xi32, #tpu.memory_space<smem>>
    %162 = arith.index_cast %161 : i32 to index
    %c0_55 = arith.constant 0 : index
    %163 = vector.load %arg2[%162, %c0_55] : memref<64x128xf32, #tpu.memory_space<vmem>>, vector<1x128xf32>
    %164 = arith.addf %158, %163 : vector<1x128xf32>
    %cst_56 = arith.constant 1.250000e-01 : f32
    %165 = vector.broadcast %cst_56 : f32 to vector<1x128xf32>
    %166 = arith.mulf %164, %165 : vector<1x128xf32>
    %167 = arith.addf %166, %0 : vector<1x128xf32>
    %c2 = arith.constant 2 : index
    %c0_57 = arith.constant 0 : index
    %168 = vector.load %arg4[%c2, %c0_57] : memref<8x128xf32, #tpu.memory_space<vmem>>, vector<1x128xf32>
    tpu.vector_store %arg4[%c2, %c0_57], %167 {strides = array<i32>} : memref<8x128xf32, #tpu.memory_space<vmem>>, vector<1x128xf32>,
    %c8_i32_58 = arith.constant 8 : i32
    %169 = arith.muli %arg0, %c8_i32_58 : i32
    %c3_i32_59 = arith.constant 3 : i32
    %170 = arith.addi %169, %c3_i32_59 : i32
    %c8_i32_60 = arith.constant 8 : i32
    %171 = arith.muli %170, %c8_i32_60 : i32
    %cst_61 = arith.constant 0.000000e+00 : f32
    %172 = vector.broadcast %cst_61 : f32 to vector<1x128xf32>
    %c0_i32_62 = arith.constant 0 : i32
    %173 = arith.addi %171, %c0_i32_62 : i32
    %174 = arith.index_cast %173 : i32 to index
    %175 = memref.load %arg1[%174] : memref<64xi32, #tpu.memory_space<smem>>
    %176 = arith.index_cast %175 : i32 to index
    %c0_63 = arith.constant 0 : index
    %177 = vector.load %arg2[%176, %c0_63] : memref<64x128xf32, #tpu.memory_space<vmem>>, vector<1x128xf32>
    %178 = arith.addf %172, %177 : vector<1x128xf32>
    %c1_i32_64 = arith.constant 1 : i32
    %179 = arith.addi %171, %c1_i32_64 : i32
    %180 = arith.index_cast %179 : i32 to index
    %181 = memref.load %arg1[%180] : memref<64xi32, #tpu.memory_space<smem>>
    %182 = arith.index_cast %181 : i32 to index
    %c0_65 = arith.constant 0 : index
    %183 = vector.load %arg2[%182, %c0_65] : memref<64x128xf32, #tpu.memory_space<vmem>>, vector<1x128xf32>
    %184 = arith.addf %178, %183 : vector<1x128xf32>
    %c2_i32_66 = arith.constant 2 : i32
    %185 = arith.addi %171, %c2_i32_66 : i32
    %186 = arith.index_cast %185 : i32 to index
    %187 = memref.load %arg1[%186] : memref<64xi32, #tpu.memory_space<smem>>
    %188 = arith.index_cast %187 : i32 to index
    %c0_67 = arith.constant 0 : index
    %189 = vector.load %arg2[%188, %c0_67] : memref<64x128xf32, #tpu.memory_space<vmem>>, vector<1x128xf32>
    %190 = arith.addf %184, %189 : vector<1x128xf32>
    %c3_i32_68 = arith.constant 3 : i32
    %191 = arith.addi %171, %c3_i32_68 : i32
    %192 = arith.index_cast %191 : i32 to index
    %193 = memref.load %arg1[%192] : memref<64xi32, #tpu.memory_space<smem>>
    %194 = arith.index_cast %193 : i32 to index
    %c0_69 = arith.constant 0 : index
    %195 = vector.load %arg2[%194, %c0_69] : memref<64x128xf32, #tpu.memory_space<vmem>>, vector<1x128xf32>
    %196 = arith.addf %190, %195 : vector<1x128xf32>
    %c4_i32_70 = arith.constant 4 : i32
    %197 = arith.addi %171, %c4_i32_70 : i32
    %198 = arith.index_cast %197 : i32 to index
    %199 = memref.load %arg1[%198] : memref<64xi32, #tpu.memory_space<smem>>
    %200 = arith.index_cast %199 : i32 to index
    %c0_71 = arith.constant 0 : index
    %201 = vector.load %arg2[%200, %c0_71] : memref<64x128xf32, #tpu.memory_space<vmem>>, vector<1x128xf32>
    %202 = arith.addf %196, %201 : vector<1x128xf32>
    %c5_i32_72 = arith.constant 5 : i32
    %203 = arith.addi %171, %c5_i32_72 : i32
    %204 = arith.index_cast %203 : i32 to index
    %205 = memref.load %arg1[%204] : memref<64xi32, #tpu.memory_space<smem>>
    %206 = arith.index_cast %205 : i32 to index
    %c0_73 = arith.constant 0 : index
    %207 = vector.load %arg2[%206, %c0_73] : memref<64x128xf32, #tpu.memory_space<vmem>>, vector<1x128xf32>
    %208 = arith.addf %202, %207 : vector<1x128xf32>
    %c6_i32_74 = arith.constant 6 : i32
    %209 = arith.addi %171, %c6_i32_74 : i32
    %210 = arith.index_cast %209 : i32 to index
    %211 = memref.load %arg1[%210] : memref<64xi32, #tpu.memory_space<smem>>
    %212 = arith.index_cast %211 : i32 to index
    %c0_75 = arith.constant 0 : index
    %213 = vector.load %arg2[%212, %c0_75] : memref<64x128xf32, #tpu.memory_space<vmem>>, vector<1x128xf32>
    %214 = arith.addf %208, %213 : vector<1x128xf32>
    %c7_i32_76 = arith.constant 7 : i32
    %215 = arith.addi %171, %c7_i32_76 : i32
    %216 = arith.index_cast %215 : i32 to index
    %217 = memref.load %arg1[%216] : memref<64xi32, #tpu.memory_space<smem>>
    %218 = arith.index_cast %217 : i32 to index
    %c0_77 = arith.constant 0 : index
    %219 = vector.load %arg2[%218, %c0_77] : memref<64x128xf32, #tpu.memory_space<vmem>>, vector<1x128xf32>
    %220 = arith.addf %214, %219 : vector<1x128xf32>
    %cst_78 = arith.constant 1.250000e-01 : f32
    %221 = vector.broadcast %cst_78 : f32 to vector<1x128xf32>
    %222 = arith.mulf %220, %221 : vector<1x128xf32>
    %223 = arith.addf %222, %0 : vector<1x128xf32>
    %c3 = arith.constant 3 : index
    %c0_79 = arith.constant 0 : index
    %224 = vector.load %arg4[%c3, %c0_79] : memref<8x128xf32, #tpu.memory_space<vmem>>, vector<1x128xf32>
    tpu.vector_store %arg4[%c3, %c0_79], %223 {strides = array<i32>} : memref<8x128xf32, #tpu.memory_space<vmem>>, vector<1x128xf32>,
    %c8_i32_80 = arith.constant 8 : i32
    %225 = arith.muli %arg0, %c8_i32_80 : i32
    %c4_i32_81 = arith.constant 4 : i32
    %226 = arith.addi %225, %c4_i32_81 : i32
    %c8_i32_82 = arith.constant 8 : i32
    %227 = arith.muli %226, %c8_i32_82 : i32
    %cst_83 = arith.constant 0.000000e+00 : f32
    %228 = vector.broadcast %cst_83 : f32 to vector<1x128xf32>
    %c0_i32_84 = arith.constant 0 : i32
    %229 = arith.addi %227, %c0_i32_84 : i32
    %230 = arith.index_cast %229 : i32 to index
    %231 = memref.load %arg1[%230] : memref<64xi32, #tpu.memory_space<smem>>
    %232 = arith.index_cast %231 : i32 to index
    %c0_85 = arith.constant 0 : index
    %233 = vector.load %arg2[%232, %c0_85] : memref<64x128xf32, #tpu.memory_space<vmem>>, vector<1x128xf32>
    %234 = arith.addf %228, %233 : vector<1x128xf32>
    %c1_i32_86 = arith.constant 1 : i32
    %235 = arith.addi %227, %c1_i32_86 : i32
    %236 = arith.index_cast %235 : i32 to index
    %237 = memref.load %arg1[%236] : memref<64xi32, #tpu.memory_space<smem>>
    %238 = arith.index_cast %237 : i32 to index
    %c0_87 = arith.constant 0 : index
    %239 = vector.load %arg2[%238, %c0_87] : memref<64x128xf32, #tpu.memory_space<vmem>>, vector<1x128xf32>
    %240 = arith.addf %234, %239 : vector<1x128xf32>
    %c2_i32_88 = arith.constant 2 : i32
    %241 = arith.addi %227, %c2_i32_88 : i32
    %242 = arith.index_cast %241 : i32 to index
    %243 = memref.load %arg1[%242] : memref<64xi32, #tpu.memory_space<smem>>
    %244 = arith.index_cast %243 : i32 to index
    %c0_89 = arith.constant 0 : index
    %245 = vector.load %arg2[%244, %c0_89] : memref<64x128xf32, #tpu.memory_space<vmem>>, vector<1x128xf32>
    %246 = arith.addf %240, %245 : vector<1x128xf32>
    %c3_i32_90 = arith.constant 3 : i32
    %247 = arith.addi %227, %c3_i32_90 : i32
    %248 = arith.index_cast %247 : i32 to index
    %249 = memref.load %arg1[%248] : memref<64xi32, #tpu.memory_space<smem>>
    %250 = arith.index_cast %249 : i32 to index
    %c0_91 = arith.constant 0 : index
    %251 = vector.load %arg2[%250, %c0_91] : memref<64x128xf32, #tpu.memory_space<vmem>>, vector<1x128xf32>
    %252 = arith.addf %246, %251 : vector<1x128xf32>
    %c4_i32_92 = arith.constant 4 : i32
    %253 = arith.addi %227, %c4_i32_92 : i32
    %254 = arith.index_cast %253 : i32 to index
    %255 = memref.load %arg1[%254] : memref<64xi32, #tpu.memory_space<smem>>
    %256 = arith.index_cast %255 : i32 to index
    %c0_93 = arith.constant 0 : index
    %257 = vector.load %arg2[%256, %c0_93] : memref<64x128xf32, #tpu.memory_space<vmem>>, vector<1x128xf32>
    %258 = arith.addf %252, %257 : vector<1x128xf32>
    %c5_i32_94 = arith.constant 5 : i32
    %259 = arith.addi %227, %c5_i32_94 : i32
    %260 = arith.index_cast %259 : i32 to index
    %261 = memref.load %arg1[%260] : memref<64xi32, #tpu.memory_space<smem>>
    %262 = arith.index_cast %261 : i32 to index
    %c0_95 = arith.constant 0 : index
    %263 = vector.load %arg2[%262, %c0_95] : memref<64x128xf32, #tpu.memory_space<vmem>>, vector<1x128xf32>
    %264 = arith.addf %258, %263 : vector<1x128xf32>
    %c6_i32_96 = arith.constant 6 : i32
    %265 = arith.addi %227, %c6_i32_96 : i32
    %266 = arith.index_cast %265 : i32 to index
    %267 = memref.load %arg1[%266] : memref<64xi32, #tpu.memory_space<smem>>
    %268 = arith.index_cast %267 : i32 to index
    %c0_97 = arith.constant 0 : index
    %269 = vector.load %arg2[%268, %c0_97] : memref<64x128xf32, #tpu.memory_space<vmem>>, vector<1x128xf32>
    %270 = arith.addf %264, %269 : vector<1x128xf32>
    %c7_i32_98 = arith.constant 7 : i32
    %271 = arith.addi %227, %c7_i32_98 : i32
    %272 = arith.index_cast %271 : i32 to index
    %273 = memref.load %arg1[%272] : memref<64xi32, #tpu.memory_space<smem>>
    %274 = arith.index_cast %273 : i32 to index
    %c0_99 = arith.constant 0 : index
    %275 = vector.load %arg2[%274, %c0_99] : memref<64x128xf32, #tpu.memory_space<vmem>>, vector<1x128xf32>
    %276 = arith.addf %270, %275 : vector<1x128xf32>
    %cst_100 = arith.constant 1.250000e-01 : f32
    %277 = vector.broadcast %cst_100 : f32 to vector<1x128xf32>
    %278 = arith.mulf %276, %277 : vector<1x128xf32>
    %279 = arith.addf %278, %0 : vector<1x128xf32>
    %c4 = arith.constant 4 : index
    %c0_101 = arith.constant 0 : index
    %280 = vector.load %arg4[%c4, %c0_101] : memref<8x128xf32, #tpu.memory_space<vmem>>, vector<1x128xf32>
    tpu.vector_store %arg4[%c4, %c0_101], %279 {strides = array<i32>} : memref<8x128xf32, #tpu.memory_space<vmem>>, vector<1x128xf32>,
    %c8_i32_102 = arith.constant 8 : i32
    %281 = arith.muli %arg0, %c8_i32_102 : i32
    %c5_i32_103 = arith.constant 5 : i32
    %282 = arith.addi %281, %c5_i32_103 : i32
    %c8_i32_104 = arith.constant 8 : i32
    %283 = arith.muli %282, %c8_i32_104 : i32
    %cst_105 = arith.constant 0.000000e+00 : f32
    %284 = vector.broadcast %cst_105 : f32 to vector<1x128xf32>
    %c0_i32_106 = arith.constant 0 : i32
    %285 = arith.addi %283, %c0_i32_106 : i32
    %286 = arith.index_cast %285 : i32 to index
    %287 = memref.load %arg1[%286] : memref<64xi32, #tpu.memory_space<smem>>
    %288 = arith.index_cast %287 : i32 to index
    %c0_107 = arith.constant 0 : index
    %289 = vector.load %arg2[%288, %c0_107] : memref<64x128xf32, #tpu.memory_space<vmem>>, vector<1x128xf32>
    %290 = arith.addf %284, %289 : vector<1x128xf32>
    %c1_i32_108 = arith.constant 1 : i32
    %291 = arith.addi %283, %c1_i32_108 : i32
    %292 = arith.index_cast %291 : i32 to index
    %293 = memref.load %arg1[%292] : memref<64xi32, #tpu.memory_space<smem>>
    %294 = arith.index_cast %293 : i32 to index
    %c0_109 = arith.constant 0 : index
    %295 = vector.load %arg2[%294, %c0_109] : memref<64x128xf32, #tpu.memory_space<vmem>>, vector<1x128xf32>
    %296 = arith.addf %290, %295 : vector<1x128xf32>
    %c2_i32_110 = arith.constant 2 : i32
    %297 = arith.addi %283, %c2_i32_110 : i32
    %298 = arith.index_cast %297 : i32 to index
    %299 = memref.load %arg1[%298] : memref<64xi32, #tpu.memory_space<smem>>
    %300 = arith.index_cast %299 : i32 to index
    %c0_111 = arith.constant 0 : index
    %301 = vector.load %arg2[%300, %c0_111] : memref<64x128xf32, #tpu.memory_space<vmem>>, vector<1x128xf32>
    %302 = arith.addf %296, %301 : vector<1x128xf32>
    %c3_i32_112 = arith.constant 3 : i32
    %303 = arith.addi %283, %c3_i32_112 : i32
    %304 = arith.index_cast %303 : i32 to index
    %305 = memref.load %arg1[%304] : memref<64xi32, #tpu.memory_space<smem>>
    %306 = arith.index_cast %305 : i32 to index
    %c0_113 = arith.constant 0 : index
    %307 = vector.load %arg2[%306, %c0_113] : memref<64x128xf32, #tpu.memory_space<vmem>>, vector<1x128xf32>
    %308 = arith.addf %302, %307 : vector<1x128xf32>
    %c4_i32_114 = arith.constant 4 : i32
    %309 = arith.addi %283, %c4_i32_114 : i32
    %310 = arith.index_cast %309 : i32 to index
    %311 = memref.load %arg1[%310] : memref<64xi32, #tpu.memory_space<smem>>
    %312 = arith.index_cast %311 : i32 to index
    %c0_115 = arith.constant 0 : index
    %313 = vector.load %arg2[%312, %c0_115] : memref<64x128xf32, #tpu.memory_space<vmem>>, vector<1x128xf32>
    %314 = arith.addf %308, %313 : vector<1x128xf32>
    %c5_i32_116 = arith.constant 5 : i32
    %315 = arith.addi %283, %c5_i32_116 : i32
    %316 = arith.index_cast %315 : i32 to index
    %317 = memref.load %arg1[%316] : memref<64xi32, #tpu.memory_space<smem>>
    %318 = arith.index_cast %317 : i32 to index
    %c0_117 = arith.constant 0 : index
    %319 = vector.load %arg2[%318, %c0_117] : memref<64x128xf32, #tpu.memory_space<vmem>>, vector<1x128xf32>
    %320 = arith.addf %314, %319 : vector<1x128xf32>
    %c6_i32_118 = arith.constant 6 : i32
    %321 = arith.addi %283, %c6_i32_118 : i32
    %322 = arith.index_cast %321 : i32 to index
    %323 = memref.load %arg1[%322] : memref<64xi32, #tpu.memory_space<smem>>
    %324 = arith.index_cast %323 : i32 to index
    %c0_119 = arith.constant 0 : index
    %325 = vector.load %arg2[%324, %c0_119] : memref<64x128xf32, #tpu.memory_space<vmem>>, vector<1x128xf32>
    %326 = arith.addf %320, %325 : vector<1x128xf32>
    %c7_i32_120 = arith.constant 7 : i32
    %327 = arith.addi %283, %c7_i32_120 : i32
    %328 = arith.index_cast %327 : i32 to index
    %329 = memref.load %arg1[%328] : memref<64xi32, #tpu.memory_space<smem>>
    %330 = arith.index_cast %329 : i32 to index
    %c0_121 = arith.constant 0 : index
    %331 = vector.load %arg2[%330, %c0_121] : memref<64x128xf32, #tpu.memory_space<vmem>>, vector<1x128xf32>
    %332 = arith.addf %326, %331 : vector<1x128xf32>
    %cst_122 = arith.constant 1.250000e-01 : f32
    %333 = vector.broadcast %cst_122 : f32 to vector<1x128xf32>
    %334 = arith.mulf %332, %333 : vector<1x128xf32>
    %335 = arith.addf %334, %0 : vector<1x128xf32>
    %c5 = arith.constant 5 : index
    %c0_123 = arith.constant 0 : index
    %336 = vector.load %arg4[%c5, %c0_123] : memref<8x128xf32, #tpu.memory_space<vmem>>, vector<1x128xf32>
    tpu.vector_store %arg4[%c5, %c0_123], %335 {strides = array<i32>} : memref<8x128xf32, #tpu.memory_space<vmem>>, vector<1x128xf32>,
    %c8_i32_124 = arith.constant 8 : i32
    %337 = arith.muli %arg0, %c8_i32_124 : i32
    %c6_i32_125 = arith.constant 6 : i32
    %338 = arith.addi %337, %c6_i32_125 : i32
    %c8_i32_126 = arith.constant 8 : i32
    %339 = arith.muli %338, %c8_i32_126 : i32
    %cst_127 = arith.constant 0.000000e+00 : f32
    %340 = vector.broadcast %cst_127 : f32 to vector<1x128xf32>
    %c0_i32_128 = arith.constant 0 : i32
    %341 = arith.addi %339, %c0_i32_128 : i32
    %342 = arith.index_cast %341 : i32 to index
    %343 = memref.load %arg1[%342] : memref<64xi32, #tpu.memory_space<smem>>
    %344 = arith.index_cast %343 : i32 to index
    %c0_129 = arith.constant 0 : index
    %345 = vector.load %arg2[%344, %c0_129] : memref<64x128xf32, #tpu.memory_space<vmem>>, vector<1x128xf32>
    %346 = arith.addf %340, %345 : vector<1x128xf32>
    %c1_i32_130 = arith.constant 1 : i32
    %347 = arith.addi %339, %c1_i32_130 : i32
    %348 = arith.index_cast %347 : i32 to index
    %349 = memref.load %arg1[%348] : memref<64xi32, #tpu.memory_space<smem>>
    %350 = arith.index_cast %349 : i32 to index
    %c0_131 = arith.constant 0 : index
    %351 = vector.load %arg2[%350, %c0_131] : memref<64x128xf32, #tpu.memory_space<vmem>>, vector<1x128xf32>
    %352 = arith.addf %346, %351 : vector<1x128xf32>
    %c2_i32_132 = arith.constant 2 : i32
    %353 = arith.addi %339, %c2_i32_132 : i32
    %354 = arith.index_cast %353 : i32 to index
    %355 = memref.load %arg1[%354] : memref<64xi32, #tpu.memory_space<smem>>
    %356 = arith.index_cast %355 : i32 to index
    %c0_133 = arith.constant 0 : index
    %357 = vector.load %arg2[%356, %c0_133] : memref<64x128xf32, #tpu.memory_space<vmem>>, vector<1x128xf32>
    %358 = arith.addf %352, %357 : vector<1x128xf32>
    %c3_i32_134 = arith.constant 3 : i32
    %359 = arith.addi %339, %c3_i32_134 : i32
    %360 = arith.index_cast %359 : i32 to index
    %361 = memref.load %arg1[%360] : memref<64xi32, #tpu.memory_space<smem>>
    %362 = arith.index_cast %361 : i32 to index
    %c0_135 = arith.constant 0 : index
    %363 = vector.load %arg2[%362, %c0_135] : memref<64x128xf32, #tpu.memory_space<vmem>>, vector<1x128xf32>
    %364 = arith.addf %358, %363 : vector<1x128xf32>
    %c4_i32_136 = arith.constant 4 : i32
    %365 = arith.addi %339, %c4_i32_136 : i32
    %366 = arith.index_cast %365 : i32 to index
    %367 = memref.load %arg1[%366] : memref<64xi32, #tpu.memory_space<smem>>
    %368 = arith.index_cast %367 : i32 to index
    %c0_137 = arith.constant 0 : index
    %369 = vector.load %arg2[%368, %c0_137] : memref<64x128xf32, #tpu.memory_space<vmem>>, vector<1x128xf32>
    %370 = arith.addf %364, %369 : vector<1x128xf32>
    %c5_i32_138 = arith.constant 5 : i32
    %371 = arith.addi %339, %c5_i32_138 : i32
    %372 = arith.index_cast %371 : i32 to index
    %373 = memref.load %arg1[%372] : memref<64xi32, #tpu.memory_space<smem>>
    %374 = arith.index_cast %373 : i32 to index
    %c0_139 = arith.constant 0 : index
    %375 = vector.load %arg2[%374, %c0_139] : memref<64x128xf32, #tpu.memory_space<vmem>>, vector<1x128xf32>
    %376 = arith.addf %370, %375 : vector<1x128xf32>
    %c6_i32_140 = arith.constant 6 : i32
    %377 = arith.addi %339, %c6_i32_140 : i32
    %378 = arith.index_cast %377 : i32 to index
    %379 = memref.load %arg1[%378] : memref<64xi32, #tpu.memory_space<smem>>
    %380 = arith.index_cast %379 : i32 to index
    %c0_141 = arith.constant 0 : index
    %381 = vector.load %arg2[%380, %c0_141] : memref<64x128xf32, #tpu.memory_space<vmem>>, vector<1x128xf32>
    %382 = arith.addf %376, %381 : vector<1x128xf32>
    %c7_i32_142 = arith.constant 7 : i32
    %383 = arith.addi %339, %c7_i32_142 : i32
    %384 = arith.index_cast %383 : i32 to index
    %385 = memref.load %arg1[%384] : memref<64xi32, #tpu.memory_space<smem>>
    %386 = arith.index_cast %385 : i32 to index
    %c0_143 = arith.constant 0 : index
    %387 = vector.load %arg2[%386, %c0_143] : memref<64x128xf32, #tpu.memory_space<vmem>>, vector<1x128xf32>
    %388 = arith.addf %382, %387 : vector<1x128xf32>
    %cst_144 = arith.constant 1.250000e-01 : f32
    %389 = vector.broadcast %cst_144 : f32 to vector<1x128xf32>
    %390 = arith.mulf %388, %389 : vector<1x128xf32>
    %391 = arith.addf %390, %0 : vector<1x128xf32>
    %c6 = arith.constant 6 : index
    %c0_145 = arith.constant 0 : index
    %392 = vector.load %arg4[%c6, %c0_145] : memref<8x128xf32, #tpu.memory_space<vmem>>, vector<1x128xf32>
    tpu.vector_store %arg4[%c6, %c0_145], %391 {strides = array<i32>} : memref<8x128xf32, #tpu.memory_space<vmem>>, vector<1x128xf32>,
    %c8_i32_146 = arith.constant 8 : i32
    %393 = arith.muli %arg0, %c8_i32_146 : i32
    %c7_i32_147 = arith.constant 7 : i32
    %394 = arith.addi %393, %c7_i32_147 : i32
    %c8_i32_148 = arith.constant 8 : i32
    %395 = arith.muli %394, %c8_i32_148 : i32
    %cst_149 = arith.constant 0.000000e+00 : f32
    %396 = vector.broadcast %cst_149 : f32 to vector<1x128xf32>
    %c0_i32_150 = arith.constant 0 : i32
    %397 = arith.addi %395, %c0_i32_150 : i32
    %398 = arith.index_cast %397 : i32 to index
    %399 = memref.load %arg1[%398] : memref<64xi32, #tpu.memory_space<smem>>
    %400 = arith.index_cast %399 : i32 to index
    %c0_151 = arith.constant 0 : index
    %401 = vector.load %arg2[%400, %c0_151] : memref<64x128xf32, #tpu.memory_space<vmem>>, vector<1x128xf32>
    %402 = arith.addf %396, %401 : vector<1x128xf32>
    %c1_i32_152 = arith.constant 1 : i32
    %403 = arith.addi %395, %c1_i32_152 : i32
    %404 = arith.index_cast %403 : i32 to index
    %405 = memref.load %arg1[%404] : memref<64xi32, #tpu.memory_space<smem>>
    %406 = arith.index_cast %405 : i32 to index
    %c0_153 = arith.constant 0 : index
    %407 = vector.load %arg2[%406, %c0_153] : memref<64x128xf32, #tpu.memory_space<vmem>>, vector<1x128xf32>
    %408 = arith.addf %402, %407 : vector<1x128xf32>
    %c2_i32_154 = arith.constant 2 : i32
    %409 = arith.addi %395, %c2_i32_154 : i32
    %410 = arith.index_cast %409 : i32 to index
    %411 = memref.load %arg1[%410] : memref<64xi32, #tpu.memory_space<smem>>
    %412 = arith.index_cast %411 : i32 to index
    %c0_155 = arith.constant 0 : index
    %413 = vector.load %arg2[%412, %c0_155] : memref<64x128xf32, #tpu.memory_space<vmem>>, vector<1x128xf32>
    %414 = arith.addf %408, %413 : vector<1x128xf32>
    %c3_i32_156 = arith.constant 3 : i32
    %415 = arith.addi %395, %c3_i32_156 : i32
    %416 = arith.index_cast %415 : i32 to index
    %417 = memref.load %arg1[%416] : memref<64xi32, #tpu.memory_space<smem>>
    %418 = arith.index_cast %417 : i32 to index
    %c0_157 = arith.constant 0 : index
    %419 = vector.load %arg2[%418, %c0_157] : memref<64x128xf32, #tpu.memory_space<vmem>>, vector<1x128xf32>
    %420 = arith.addf %414, %419 : vector<1x128xf32>
    %c4_i32_158 = arith.constant 4 : i32
    %421 = arith.addi %395, %c4_i32_158 : i32
    %422 = arith.index_cast %421 : i32 to index
    %423 = memref.load %arg1[%422] : memref<64xi32, #tpu.memory_space<smem>>
    %424 = arith.index_cast %423 : i32 to index
    %c0_159 = arith.constant 0 : index
    %425 = vector.load %arg2[%424, %c0_159] : memref<64x128xf32, #tpu.memory_space<vmem>>, vector<1x128xf32>
    %426 = arith.addf %420, %425 : vector<1x128xf32>
    %c5_i32_160 = arith.constant 5 : i32
    %427 = arith.addi %395, %c5_i32_160 : i32
    %428 = arith.index_cast %427 : i32 to index
    %429 = memref.load %arg1[%428] : memref<64xi32, #tpu.memory_space<smem>>
    %430 = arith.index_cast %429 : i32 to index
    %c0_161 = arith.constant 0 : index
    %431 = vector.load %arg2[%430, %c0_161] : memref<64x128xf32, #tpu.memory_space<vmem>>, vector<1x128xf32>
    %432 = arith.addf %426, %431 : vector<1x128xf32>
    %c6_i32_162 = arith.constant 6 : i32
    %433 = arith.addi %395, %c6_i32_162 : i32
    %434 = arith.index_cast %433 : i32 to index
    %435 = memref.load %arg1[%434] : memref<64xi32, #tpu.memory_space<smem>>
    %436 = arith.index_cast %435 : i32 to index
    %c0_163 = arith.constant 0 : index
    %437 = vector.load %arg2[%436, %c0_163] : memref<64x128xf32, #tpu.memory_space<vmem>>, vector<1x128xf32>
    %438 = arith.addf %432, %437 : vector<1x128xf32>
    %c7_i32_164 = arith.constant 7 : i32
    %439 = arith.addi %395, %c7_i32_164 : i32
    %440 = arith.index_cast %439 : i32 to index
    %441 = memref.load %arg1[%440] : memref<64xi32, #tpu.memory_space<smem>>
    %442 = arith.index_cast %441 : i32 to index
    %c0_165 = arith.constant 0 : index
    %443 = vector.load %arg2[%442, %c0_165] : memref<64x128xf32, #tpu.memory_space<vmem>>, vector<1x128xf32>
    %444 = arith.addf %438, %443 : vector<1x128xf32>
    %cst_166 = arith.constant 1.250000e-01 : f32
    %445 = vector.broadcast %cst_166 : f32 to vector<1x128xf32>
    %446 = arith.mulf %444, %445 : vector<1x128xf32>
    %447 = arith.addf %446, %0 : vector<1x128xf32>
    %c7 = arith.constant 7 : index
    %c0_167 = arith.constant 0 : index
    %448 = vector.load %arg4[%c7, %c0_167] : memref<8x128xf32, #tpu.memory_space<vmem>>, vector<1x128xf32>
    tpu.vector_store %arg4[%c7, %c0_167], %447 {strides = array<i32>} : memref<8x128xf32, #tpu.memory_space<vmem>>, vector<1x128xf32>,
    return
  }
  func.func @transform_0(%arg0: i32, %arg1: memref<64xi32, #tpu.memory_space<smem>>) -> (i32, i32) {
    %c0_i32 = arith.constant 0 : i32
    %c0_i32_0 = arith.constant 0 : i32
    %c0_i32_1 = arith.constant 0 : i32
    return %c0_i32, %c0_i32_0 : i32, i32
  }
  func.func @transform_1(%arg0: i32, %arg1: memref<64xi32, #tpu.memory_space<smem>>) -> (i32, i32) {
    %c0_i32 = arith.constant 0 : i32
    %c0_i32_0 = arith.constant 0 : i32
    %c0_i32_1 = arith.constant 0 : i32
    return %c0_i32, %c0_i32_0 : i32, i32
  }
  func.func @transform_2(%arg0: i32, %arg1: memref<64xi32, #tpu.memory_space<smem>>) -> (i32, i32) {
    %c0_i32 = arith.constant 0 : i32
    %c0_i32_0 = arith.constant 0 : i32
    return %arg0, %c0_i32 : i32, i32
  }
}

</mosaic_0001>

<bundles_post_ra>
// kernel: tpu_custom_call.1
= control target key start
LH: loop header
LB: loop body
LE: loop exit
PB: predicated region body
PF: predicated region fallthrough
CT: control target
= control target key end

     0   :  { %s585_s12 = smov [#allocation3]   ;;  %s746_s0 = inlined_call_operand.hbm [shape: s32[64], index: 0, kind: input, shape index: {}]   ;;  %s747_s1 = inlined_call_operand.hbm [shape: f32[64,128], index: 1, kind: input, shape index: {}]   ;;  %s748_s2 = inlined_call_operand.vmem [shape: f32[1,128], index: 2, kind: input, shape index: {}]   ;;  %s749_s3 = inlined_call_operand.hbm [shape: f32[8,128], index: 3, kind: output, shape index: {}]  }
   0x1   :  { %9 = dma.hbm_to_smem %s746_s0, 16, %s585_s12, [#allocation2] }
   0x2   :  { %579 = dma.done.wait [#allocation2], 16 }
   0x3   :  { %580 = vsyncadd [#allocation2], 4294967280 }
   0x4   :  { %11 = sfence }
   0x5   :  { %12 = vsyncpa [#allocation5], 0 }
   0x6   :  { %13 = vsyncpa [#allocation6], 0  ;;  %s586_s15 = smov [#allocation4]  }
   0x7   :  { %s19_s16 = sshll.u32 %s586_s15, 4  ;;  %s20_s16 = int_to_ptr.vmem [resolvable:$true] %s19_s16 }
   0x8   :  { %s547_s17 = scalar_lea.vmem %s20_s16, 1024  ;;  %p552_p1 = scmp.lt.s32.totalorder %s20_s16, %s20_s16 }
   0x9   :  { %p548_p0 = scmp.ne.s32.totalorder %s20_s16, %s547_s17  ;;  %p553_p2 = scmp.lt.s32.totalorder %s547_s17, %s547_s17 }
   0xb   :  { %p554_p3 = por %p553_p2, %p552_p1 }
   0xd   :  { %p555_p4 = pnand %p554_p3, %p548_p0 }
   0xf   :  { %558 = shalt.err (!%p555_p4)
}
  0x10   :  { %s587_s18 = smov 128   ;;  %s588_s19 = smov 8  }
  0x11   :  { %25 = dma.hbm_to_vmem [thread:$0]  %s747_s1, 1024, %s20_s16, [#allocation5], %s587_s18, %s587_s18, %s588_s19  }
  0x12   :  { %581 = dma.done.wait [#allocation5], 1024  }
  0x13   :  { %582 = vsyncadd [#allocation5], 4294966272  ;;  %s33_s0 = sld [smem:[#allocation3]]  ;;  %v631_v20 = vld [vmem:[%s748_s2] sm:$0x1] }
  0x14   :  { %s463_s22 = sld [smem:[#allocation3 + $0x1]] }
  0x15   :  { %s464_s23 = sld [smem:[#allocation3 + $0x2]] }
  0x16   :  { %s465_s24 = sld [smem:[#allocation3 + $0x3]] }
  0x17   :  { %s466_s25 = sld [smem:[#allocation3 + $0x4]] }
  0x18   :  { %s467_s26 = sld [smem:[#allocation3 + $0x5]] }
  0x19   :  { %s468_s27 = sld [smem:[#allocation3 + $0x6]]  ;;  %s34_s28 = scalar_lea.vmem [#allocation4], %s33_s0 }
  0x1a   :  { %v35_v0 = vld [vmem:[%s34_s28] sm:$0x1]  ;;  %s469_s29 = sld [smem:[#allocation3 + $0x7]]  ;;  %s39_s30 = scalar_lea.vmem [#allocation4], %s463_s22 }
  0x1b   :  { %v40_v1 = vld [vmem:[%s39_s30] sm:$0x1]  ;;  %s470_s4 = sld [smem:[#allocation3 + $0x8]]  ;;  %s44_s5 = scalar_lea.vmem [#allocation4], %s464_s23 }
  0x1c   :  { %v41_v2 = vadd.f32 %v40_v1, %v35_v0  ;;  %v45_v3 = vld [vmem:[%s44_s5] sm:$0x1]  ;;  %s471_s6 = sld [smem:[#allocation3 + $0x9]]  ;;  %s49_s1 = scalar_lea.vmem [#allocation4], %s465_s24 }
  0x1d   :  { %v50_v4 = vld [vmem:[%s49_s1] sm:$0x1]  ;;  %s472_s7 = sld [smem:[#allocation3 + $0xa]]  ;;  %s54_s9 = scalar_lea.vmem [#allocation4], %s466_s25 }
  0x1e   :  { %v46_v5 = vadd.f32 %v45_v3, %v41_v2  ;;  %s473_s8 = sld [smem:[#allocation3 + $0xb]]  ;;  %v55_v6 = vld [vmem:[%s54_s9] sm:$0x1]  ;;  %s59_s11 = scalar_lea.vmem [#allocation4], %s467_s26 }
  0x1f   :  { %s616_s10 = sld [smem:[#allocation3 + $0xc]]  ;;  %v60_v8 = vld [vmem:[%s59_s11] sm:$0x1]  ;;  %s64_s13 = scalar_lea.vmem [#allocation4], %s468_s27 }
  0x20   :  { %v51_v7 = vadd.f32 %v50_v4, %v46_v5  ;;  %s618_s12 = sld [smem:[#allocation3 + $0xd]]  ;;  %v65_v9 = vld [vmem:[%s64_s13] sm:$0x1]  ;;  %s69_s17 = scalar_lea.vmem [#allocation4], %s469_s29 }
  0x21   :  { %s620_s14 = sld [smem:[#allocation3 + $0xe]]  ;;  %s79_s15 = scalar_lea.vmem [#allocation4], %s470_s4  ;;  %v70_v12 = vld [vmem:[%s69_s17] sm:$0x1] }
  0x22   :  { %v56_v10 = vadd.f32 %v55_v6, %v51_v7  ;;  %v80_v11 = vld [vmem:[%s79_s15] sm:$0x1]  ;;  %s622_s16 = sld [smem:[#allocation3 + $0xf]]  ;;  %s84_s18 = scalar_lea.vmem [#allocation4], %s471_s6 }
  0x23   :  { %v85_v13 = vld [vmem:[%s84_s18] sm:$0x1]  ;;  %s478_s19 = sld [smem:[#allocation3 + $0x10]]  ;;  %s89_s20 = scalar_lea.vmem [#allocation4], %s472_s7 }
  0x24   :  { %v61_v14 = vadd.f32 %v60_v8, %v56_v10  ;;  %v86_v15 = vadd.f32 %v85_v13, %v80_v11  ;;  %v90_v16 = vld [vmem:[%s89_s20] sm:$0x1]  ;;  %s479_s21 = sld [smem:[#allocation3 + $0x11]]  ;;  %s94_s0 = scalar_lea.vmem [#allocation4], %s473_s8 }
  0x25   :  { %v95_v17 = vld [vmem:[%s94_s0] sm:$0x1]  ;;  %s624_s22 = sld [smem:[#allocation3 + $0x12]]  ;;  %s99_s26 = scalar_lea.vmem [#allocation4], %s616_s10 }
  0x26   :  { %v66_v18 = vadd.f32 %v65_v9, %v61_v14  ;;  %v91_v19 = vadd.f32 %v90_v16, %v86_v15  ;;  %s626_s23 = sld [smem:[#allocation3 + $0x13]]  ;;  %v100_v21 = vld [vmem:[%s99_s26] sm:$0x1]  ;;  %s104_s28 = scalar_lea.vmem [#allocation4], %s618_s12 }
  0x27   :  { %s634_s27 = sld [smem:[#allocation3 + $0x14]]  ;;  %v105_v24 = vld [vmem:[%s104_s28] sm:$0x1]  ;;  %s109_s30 = scalar_lea.vmem [#allocation4], %s620_s14 }
  0x28   :  { %v71_v22 = vadd.f32 %v70_v12, %v66_v18  ;;  %v96_v23 = vadd.f32 %v95_v17, %v91_v19  ;;  %s637_s29 = sld [smem:[#allocation3 + $0x15]]  ;;  %v110_v25 = vld [vmem:[%s109_s30] sm:$0x1]  ;;  %s114_s6 = scalar_lea.vmem [#allocation4], %s622_s16 }
  0x29   :  { %s640_s4 = sld [smem:[#allocation3 + $0x16]]  ;;  %s123_s2 = scalar_lea.vmem [#allocation4], %s478_s19  ;;  %v115_v29 = vld [vmem:[%s114_s6] sm:$0x1] }
  0x2a   :  { %v72_v26 = vmul.f32 0.125, %v71_v22  ;;  %v101_v27 = vadd.f32 %v100_v21, %v96_v23  ;;  %v124_v28 = vld [vmem:[%s123_s2] sm:$0x1]  ;;  %s642_s5 = sld [smem:[#allocation3 + $0x17]]  ;;  %s128_s1 = scalar_lea.vmem [#allocation4], %s479_s21 }
  0x2b   :  { %v129_v30 = vld [vmem:[%s128_s1] sm:$0x1]  ;;  %s486_s7 = sld [smem:[#allocation3 + $0x18]]  ;;  %s133_s8 = scalar_lea.vmem [#allocation4], %s624_s22 }
  0x2c   :  { %v73_v31 = vadd.f32 %v72_v26, %v631_v20  ;;  %v106_v32 = vadd.f32 %v105_v24, %v101_v27  ;;  %v130_v33 = vadd.f32 %v129_v30, %v124_v28  ;;  %v134_v34 = vld [vmem:[%s133_s8] sm:$0x1]  ;;  %s487_s9 = sld [smem:[#allocation3 + $0x19]]  ;;  %s138_s10 = scalar_lea.vmem [#allocation4], %s626_s23 }
  0x2d   :  { %v139_v35 = vld [vmem:[%s138_s10] sm:$0x1]  ;;  %s648_s11 = sld [smem:[#allocation3 + $0x1a]]  ;;  %s143_s13 = scalar_lea.vmem [#allocation4], %s634_s27 }
  0x2e   :  { %74 = vst [vmem:[#allocation7] sm:$0x1] %v73_v31  ;;  %v111_v36 = vadd.f32 %v110_v25, %v106_v32  ;;  %v135_v37 = vadd.f32 %v134_v34, %v130_v33  ;;  %s650_s12 = sld [smem:[#allocation3 + $0x1b]]  ;;  %v144_v38 = vld [vmem:[%s143_s13] sm:$0x1]  ;;  %s148_s15 = scalar_lea.vmem [#allocation4], %s637_s29 }
  0x2f   :  { %s653_s14 = sld [smem:[#allocation3 + $0x1c]]  ;;  %v149_v41 = vld [vmem:[%s148_s15] sm:$0x1]  ;;  %s153_s17 = scalar_lea.vmem [#allocation4], %s640_s4 }
  0x30   :  { %v116_v39 = vadd.f32 %v115_v29, %v111_v36  ;;  %v140_v40 = vadd.f32 %v139_v35, %v135_v37  ;;  %s656_s16 = sld [smem:[#allocation3 + $0x1d]]  ;;  %v154_v42 = vld [vmem:[%s153_s17] sm:$0x1]  ;;  %s158_s21 = scalar_lea.vmem [#allocation4], %s642_s5 }
  0x31   :  { %s659_s18 = sld [smem:[#allocation3 + $0x1e]]  ;;  %s167_s19 = scalar_lea.vmem [#allocation4], %s486_s7  ;;  %v159_v46 = vld [vmem:[%s158_s21] sm:$0x1] }
  0x32   :  { %v117_v43 = vmul.f32 0.125, %v116_v39  ;;  %v145_v44 = vadd.f32 %v144_v38, %v140_v40  ;;  %v168_v45 = vld [vmem:[%s167_s19] sm:$0x1]  ;;  %s661_s20 = sld [smem:[#allocation3 + $0x1f]]  ;;  %s172_s0 = scalar_lea.vmem [#allocation4], %s487_s9 }
  0x33   :  { %v173_v47 = vld [vmem:[%s172_s0] sm:$0x1]  ;;  %s494_s22 = sld [smem:[#allocation3 + $0x20]]  ;;  %s177_s23 = scalar_lea.vmem [#allocation4], %s648_s11 }
  0x34   :  { %v118_v48 = vadd.f32 %v117_v43, %v631_v20  ;;  %v150_v49 = vadd.f32 %v149_v41, %v145_v44  ;;  %v174_v50 = vadd.f32 %v173_v47, %v168_v45  ;;  %v178_v51 = vld [vmem:[%s177_s23] sm:$0x1]  ;;  %s495_s24 = sld [smem:[#allocation3 + $0x21]]  ;;  %s182_s25 = scalar_lea.vmem [#allocation4], %s650_s12 }
  0x35   :  { %v183_v52 = vld [vmem:[%s182_s25] sm:$0x1]  ;;  %s667_s26 = sld [smem:[#allocation3 + $0x22]]  ;;  %s187_s28 = scalar_lea.vmem [#allocation4], %s653_s14 }
  0x36   :  { %119 = vst [vmem:[#allocation7 + $0x1] sm:$0x1] %v118_v48  ;;  %v155_v53 = vadd.f32 %v154_v42, %v150_v49  ;;  %v179_v54 = vadd.f32 %v178_v51, %v174_v50  ;;  %s669_s27 = sld [smem:[#allocation3 + $0x23]]  ;;  %v188_v55 = vld [vmem:[%s187_s28] sm:$0x1]  ;;  %s192_s30 = scalar_lea.vmem [#allocation4], %s656_s16 }
  0x37   :  { %s672_s29 = sld [smem:[#allocation3 + $0x24]]  ;;  %v193_v58 = vld [vmem:[%s192_s30] sm:$0x1]  ;;  %s197_s2 = scalar_lea.vmem [#allocation4], %s659_s18 }
  0x38   :  { %v160_v56 = vadd.f32 %v159_v46, %v155_v53  ;;  %v184_v57 = vadd.f32 %v183_v52, %v179_v54  ;;  %s675_s4 = sld [smem:[#allocation3 + $0x25]]  ;;  %v198_v59 = vld [vmem:[%s197_s2] sm:$0x1]  ;;  %s202_s7 = scalar_lea.vmem [#allocation4], %s661_s20 }
  0x39   :  { %s678_s5 = sld [smem:[#allocation3 + $0x26]]  ;;  %s211_s6 = scalar_lea.vmem [#allocation4], %s494_s22  ;;  %v203_v63 = vld [vmem:[%s202_s7] sm:$0x1] }
  0x3a   :  { %v161_v60 = vmul.f32 0.125, %v160_v56  ;;  %v189_v61 = vadd.f32 %v188_v55, %v184_v57  ;;  %v212_v62 = vld [vmem:[%s211_s6] sm:$0x1]  ;;  %s680_s1 = sld [smem:[#allocation3 + $0x27]]  ;;  %s216_s8 = scalar_lea.vmem [#allocation4], %s495_s24 }
  0x3b   :  { %v217_v0 = vld [vmem:[%s216_s8] sm:$0x1]  ;;  %s502_s9 = sld [smem:[#allocation3 + $0x28]]  ;;  %s221_s10 = scalar_lea.vmem [#allocation4], %s667_s26 }
  0x3c   :  { %v162_v1 = vadd.f32 %v161_v60, %v631_v20  ;;  %v194_v2 = vadd.f32 %v193_v58, %v189_v61  ;;  %v218_v3 = vadd.f32 %v217_v0, %v212_v62  ;;  %v222_v4 = vld [vmem:[%s221_s10] sm:$0x1]  ;;  %s503_s11 = sld [smem:[#allocation3 + $0x29]]  ;;  %s226_s12 = scalar_lea.vmem [#allocation4], %s669_s27 }
  0x3d   :  { %v227_v5 = vld [vmem:[%s226_s12] sm:$0x1]  ;;  %s686_s13 = sld [smem:[#allocation3 + $0x2a]]  ;;  %s231_s15 = scalar_lea.vmem [#allocation4], %s672_s29 }
  0x3e   :  { %163 = vst [vmem:[#allocation7 + $0x2] sm:$0x1] %v162_v1  ;;  %v199_v6 = vadd.f32 %v198_v59, %v194_v2  ;;  %v223_v7 = vadd.f32 %v222_v4, %v218_v3  ;;  %s688_s14 = sld [smem:[#allocation3 + $0x2b]]  ;;  %v232_v8 = vld [vmem:[%s231_s15] sm:$0x1]  ;;  %s236_s17 = scalar_lea.vmem [#allocation4], %s675_s4 }
  0x3f   :  { %s691_s16 = sld [smem:[#allocation3 + $0x2c]]  ;;  %v237_v11 = vld [vmem:[%s236_s17] sm:$0x1]  ;;  %s241_s19 = scalar_lea.vmem [#allocation4], %s678_s5 }
  0x40   :  { %v204_v9 = vadd.f32 %v203_v63, %v199_v6  ;;  %v228_v10 = vadd.f32 %v227_v5, %v223_v7  ;;  %s694_s18 = sld [smem:[#allocation3 + $0x2d]]  ;;  %v242_v12 = vld [vmem:[%s241_s19] sm:$0x1]  ;;  %s246_s22 = scalar_lea.vmem [#allocation4], %s680_s1 }
  0x41   :  { %s697_s20 = sld [smem:[#allocation3 + $0x2e]]  ;;  %s255_s21 = scalar_lea.vmem [#allocation4], %s502_s9  ;;  %v247_v16 = vld [vmem:[%s246_s22] sm:$0x1] }
  0x42   :  { %v205_v13 = vmul.f32 0.125, %v204_v9  ;;  %v233_v14 = vadd.f32 %v232_v8, %v228_v10  ;;  %v256_v15 = vld [vmem:[%s255_s21] sm:$0x1]  ;;  %s699_s0 = sld [smem:[#allocation3 + $0x2f]]  ;;  %s260_s23 = scalar_lea.vmem [#allocation4], %s503_s11 }
  0x43   :  { %v261_v17 = vld [vmem:[%s260_s23] sm:$0x1]  ;;  %s510_s24 = sld [smem:[#allocation3 + $0x30]]  ;;  %s265_s25 = scalar_lea.vmem [#allocation4], %s686_s13 }
  0x44   :  { %v206_v18 = vadd.f32 %v205_v13, %v631_v20  ;;  %v238_v19 = vadd.f32 %v237_v11, %v233_v14  ;;  %v262_v21 = vadd.f32 %v261_v17, %v256_v15  ;;  %v266_v22 = vld [vmem:[%s265_s25] sm:$0x1]  ;;  %s511_s26 = sld [smem:[#allocation3 + $0x31]]  ;;  %s270_s27 = scalar_lea.vmem [#allocation4], %s688_s14 }
  0x45   :  { %v271_v23 = vld [vmem:[%s270_s27] sm:$0x1]  ;;  %s705_s28 = sld [smem:[#allocation3 + $0x32]]  ;;  %s275_s30 = scalar_lea.vmem [#allocation4], %s691_s16 }
  0x46   :  { %207 = vst [vmem:[#allocation7 + $0x3] sm:$0x1] %v206_v18  ;;  %v243_v24 = vadd.f32 %v242_v12, %v238_v19  ;;  %v267_v25 = vadd.f32 %v266_v22, %v262_v21  ;;  %s707_s29 = sld [smem:[#allocation3 + $0x33]]  ;;  %v276_v26 = vld [vmem:[%s275_s30] sm:$0x1]  ;;  %s280_s2 = scalar_lea.vmem [#allocation4], %s694_s18 }
  0x47   :  { %s710_s4 = sld [smem:[#allocation3 + $0x34]]  ;;  %v281_v29 = vld [vmem:[%s280_s2] sm:$0x1]  ;;  %s285_s6 = scalar_lea.vmem [#allocation4], %s697_s20 }
  0x48   :  { %v248_v27 = vadd.f32 %v247_v16, %v243_v24  ;;  %v272_v28 = vadd.f32 %v271_v23, %v267_v25  ;;  %s713_s5 = sld [smem:[#allocation3 + $0x35]]  ;;  %v286_v30 = vld [vmem:[%s285_s6] sm:$0x1]  ;;  %s290_s9 = scalar_lea.vmem [#allocation4], %s699_s0 }
  0x49   :  { %s716_s1 = sld [smem:[#allocation3 + $0x36]]  ;;  %s299_s7 = scalar_lea.vmem [#allocation4], %s510_s24  ;;  %v291_v34 = vld [vmem:[%s290_s9] sm:$0x1] }
  0x4a   :  { %v249_v31 = vmul.f32 0.125, %v248_v27  ;;  %v277_v32 = vadd.f32 %v276_v26, %v272_v28  ;;  %v300_v33 = vld [vmem:[%s299_s7] sm:$0x1]  ;;  %s718_s8 = sld [smem:[#allocation3 + $0x37]]  ;;  %s304_s10 = scalar_lea.vmem [#allocation4], %s511_s26 }
  0x4b   :  { %v305_v35 = vld [vmem:[%s304_s10] sm:$0x1]  ;;  %s518_s11 = sld [smem:[#allocation3 + $0x38]]  ;;  %s309_s12 = scalar_lea.vmem [#allocation4], %s705_s28 }
  0x4c   :  { %v250_v36 = vadd.f32 %v249_v31, %v631_v20  ;;  %v282_v37 = vadd.f32 %v281_v29, %v277_v32  ;;  %v306_v38 = vadd.f32 %v305_v35, %v300_v33  ;;  %v310_v39 = vld [vmem:[%s309_s12] sm:$0x1]  ;;  %s519_s13 = sld [smem:[#allocation3 + $0x39]]  ;;  %s314_s14 = scalar_lea.vmem [#allocation4], %s707_s29 }
  0x4d   :  { %v315_v40 = vld [vmem:[%s314_s14] sm:$0x1]  ;;  %s520_s15 = sld [smem:[#allocation3 + $0x3a]]  ;;  %s319_s17 = scalar_lea.vmem [#allocation4], %s710_s4 }
  0x4e   :  { %251 = vst [vmem:[#allocation7 + $0x4] sm:$0x1] %v250_v36  ;;  %v287_v41 = vadd.f32 %v286_v30, %v282_v37  ;;  %v311_v42 = vadd.f32 %v310_v39, %v306_v38  ;;  %s521_s16 = sld [smem:[#allocation3 + $0x3b]]  ;;  %v320_v43 = vld [vmem:[%s319_s17] sm:$0x1]  ;;  %s324_s20 = scalar_lea.vmem [#allocation4], %s713_s5 }
  0x4f   :  { %s725_s18 = sld [smem:[#allocation3 + $0x3c]]  ;;  %v325_v46 = vld [vmem:[%s324_s20] sm:$0x1]  ;;  %s329_s23 = scalar_lea.vmem [#allocation4], %s716_s1 }
  0x50   :  { %v292_v44 = vadd.f32 %v291_v34, %v287_v41  ;;  %v316_v45 = vadd.f32 %v315_v40, %v311_v42  ;;  %s727_s19 = sld [smem:[#allocation3 + $0x3d]]  ;;  %v330_v50 = vld [vmem:[%s329_s23] sm:$0x1]  ;;  %s334_s26 = scalar_lea.vmem [#allocation4], %s718_s8 }
  0x51   :  { %s730_s21 = sld [smem:[#allocation3 + $0x3e]]  ;;  %s343_s0 = scalar_lea.vmem [#allocation4], %s518_s11  ;;  %v335_v56 = vld [vmem:[%s334_s26] sm:$0x1] }
  0x52   :  { %v293_v47 = vmul.f32 0.125, %v292_v44  ;;  %v321_v48 = vadd.f32 %v320_v43, %v316_v45  ;;  %v344_v49 = vld [vmem:[%s343_s0] sm:$0x1]  ;;  %s732_s22 = sld [smem:[#allocation3 + $0x3f]]  ;;  %s348_s24 = scalar_lea.vmem [#allocation4], %s519_s13 }
  0x53   :  { %v349_v51 = vld [vmem:[%s348_s24] sm:$0x1]  ;;  %s353_s25 = scalar_lea.vmem [#allocation4], %s520_s15  ;;  %s589_s2 = smov [#allocation7]  }
  0x54   :  { %v294_v52 = vadd.f32 %v293_v47, %v631_v20  ;;  %v326_v53 = vadd.f32 %v325_v46, %v321_v48  ;;  %v350_v54 = vadd.f32 %v349_v51, %v344_v49  ;;  %v354_v55 = vld [vmem:[%s353_s25] sm:$0x1]  ;;  %s358_s27 = scalar_lea.vmem [#allocation4], %s521_s16  ;;  %s390_s5 = sshll.u32 %s589_s2, 4  ;;  %s391_s5 = int_to_ptr.vmem [resolvable:$true] %s390_s5 }
  0x55   :  { %v359_v57 = vld [vmem:[%s358_s27] sm:$0x1]  ;;  %s363_s28 = scalar_lea.vmem [#allocation4], %s725_s18  ;;  %s559_s6 = scalar_lea.vmem %s391_s5, 128 }
  0x56   :  { %295 = vst [vmem:[#allocation7 + $0x5] sm:$0x1] %v294_v52  ;;  %v331_v58 = vadd.f32 %v330_v50, %v326_v53  ;;  %v355_v59 = vadd.f32 %v354_v55, %v350_v54  ;;  %v364_v60 = vld [vmem:[%s363_s28] sm:$0x1]  ;;  %s368_s29 = scalar_lea.vmem [#allocation4], %s727_s19  ;;  %p560_p5 = scmp.ne.s32.totalorder %s391_s5, %s559_s6 }
  0x57   :  { %v369_v63 = vld [vmem:[%s368_s29] sm:$0x1]  ;;  %s373_s30 = scalar_lea.vmem [#allocation4], %s730_s21  ;;  %p564_p6 = scmp.lt.s32.totalorder %s391_s5, %s391_s5 }
  0x58   :  { %v336_v61 = vadd.f32 %v335_v56, %v331_v58  ;;  %v360_v62 = vadd.f32 %v359_v57, %v355_v59  ;;  %v374_v2 = vld [vmem:[%s373_s30] sm:$0x1]  ;;  %s378_s4 = scalar_lea.vmem [#allocation4], %s732_s22  ;;  %p565_p7 = scmp.lt.s32.totalorder %s559_s6, %s559_s6 }
  0x59   :  { %v379_v5 = vld [vmem:[%s378_s4] sm:$0x1] }
  0x5a   :  { %v337_v0 = vmul.f32 0.125, %v336_v61  ;;  %v365_v1 = vadd.f32 %v364_v60, %v360_v62  ;;  %p566_p8 = por %p565_p7, %p564_p6 }
  0x5c   :  { %v338_v3 = vadd.f32 %v337_v0, %v631_v20  ;;  %v370_v4 = vadd.f32 %v369_v63, %v365_v1  ;;  %p567_p9 = pnand %p566_p8, %p560_p5 }
  0x5e   :  { %339 = vst [vmem:[#allocation7 + $0x6] sm:$0x1] %v338_v3  ;;  %v375_v6 = vadd.f32 %v374_v2, %v370_v4 }
  0x60   :  { %v380_v7 = vadd.f32 %v379_v5, %v375_v6 }
  0x62   :  { %v381_v8 = vmul.f32 0.125, %v380_v7 }
  0x64   :  { %v382_v9 = vadd.f32 %v381_v8, %v631_v20 }
  0x66   :  { %383 = vst [vmem:[#allocation7 + $0x7] sm:$0x1] %v382_v9 }
  0x67   :  { %570 = shalt.err (!%p567_p9)
}
  0x68   :  { %393 = dma.vmem_to_hbm [thread:$0]  %s391_s5, 128, %s749_s3, [#allocation6]  }
  0x69   :  { %583 = dma.done.wait [#allocation6], 128  }
  0x6a   :  { %584 = vsyncadd [#allocation6], 4294967168 }
  0x6b   :  { %397 = vsyncpa [#allocation5], 1 }
  0x6c   :  { %398 = vsyncpa [#allocation6], 1 }

</bundles_post_ra>
